<compile_context>
chip_gen: v7x
topology: tpu7x:2x2x1
jax: 0.10.0
libtpu: 0.0.40
codegen_flags: <defaults>
</compile_context>

<pallas_src>
import math

import jax
import jax.numpy as jnp
from jax.experimental import pallas as pl
from jax.experimental.pallas import tpu as pltpu

LANE = 128          # lane width: Linear output feature dims padded to this
SUBLANE = 8         # f32 sublane packing: batch tiles are multiples of this
MAX_TILE_B = 512    # upper bound on batch tile rows
VMEM_CAP_BYTES = 56 * 1024 * 1024   # stay under v7x's 64 MiB physical VMEM


def _round_up(x, m):
    return ((x + m - 1) // m) * m


def _largest_tile(b8, max_tile):
    """Largest multiple-of-SUBLANE divisor of b8 that is <= max_tile."""
    max_tile = max(SUBLANE, (max_tile // SUBLANE) * SUBLANE)
    best = SUBLANE
    t = SUBLANE
    upper = min(b8, max_tile)
    while t <= upper:
        if b8 % t == 0:
            best = t
        t += SUBLANE
    return best


# ----------------------------------------------------------------------------
# Fused sequential forward: one pallas_call for an arbitrary module chain
# ----------------------------------------------------------------------------

_FUSED_CACHE = {}


def _build_fused_call(modules, batch, in_f, dtype):
    """Builds a jitted callable running `modules` as a single Pallas kernel."""
    itemsize = jnp.dtype(dtype).itemsize

    # Walk the chain once: prepared (padded, bf16) params + width bookkeeping.
    prepared = []        # flat list of prepared parameter arrays
    counts = []          # number of fused params per module
    cur_f, cur_w = in_f, in_f
    max_w = in_f
    per_row_flops = 0
    per_row_transc = 0
    for m in modules:
        p = m.prepared_params(cur_w)
        counts.append(len(p))
        prepared.extend(p)
        fl, tr = m.per_row_cost(cur_w)
        per_row_flops += fl
        per_row_transc += tr
        cur_f, cur_w = m.out_widths(cur_f, cur_w)
        max_w = max(max_w, cur_w)
    out_f, out_w = cur_f, cur_w

    param_bytes = sum(p.size * p.dtype.itemsize for p in prepared)

    # ---- batch tiling + explicit VMEM budget ------------------------------
    b_pad = _round_up(batch, SUBLANE)
    max_tile = MAX_TILE_B
    while True:
        tile_b = _largest_tile(b_pad, max_tile)
        x_tile_bytes = tile_b * in_f * itemsize
        o_tile_bytes = tile_b * out_w * itemsize
        interm_bytes = 3 * tile_b * max_w * 4          # live f32 intermediates
        budget = (2 * (param_bytes + x_tile_bytes + o_tile_bytes)
                  + interm_bytes + (4 << 20))          # + headroom
        if budget <= VMEM_CAP_BYTES or tile_b <= SUBLANE:
            break
        max_tile = max(SUBLANE, tile_b // 2)

    grid = (b_pad // tile_b,)
    vmem_limit = int(min(max(2 * budget, 16 << 20), VMEM_CAP_BYTES))

    # ---- kernel ------------------------------------------------------------
    def kernel(x_ref, *refs):
        o_ref = refs[-1]
        p_refs = refs[:-1]
        h = x_ref[...]
        idx = 0
        # Traced once -> single fused body; each Linear is a bf16 MXU matmul
        # with f32 accumulate, bias/relu/tanh are f32 VPU/EUP filler.
        for m, n in zip(modules, counts):
            h = m.apply(h, p_refs[idx:idx + n])
            idx += n
        o_ref[...] = h.astype(o_ref.dtype)

    # x: full-extent (unpadded) feature dim -> no wrapper-side feature pad.
    in_specs = [pl.BlockSpec((tile_b, in_f), lambda i: (i, 0))]
    for p in prepared:
        # Params: single full-extent block, constant index_map -> VMEM-resident
        # across all batch tiles.
        in_specs.append(pl.BlockSpec(p.shape, lambda i: (0, 0)))

    out_spec = pl.BlockSpec((tile_b, out_w), lambda i: (i, 0))

    cost = pl.CostEstimate(
        flops=int(per_row_flops * b_pad),
        transcendentals=int(per_row_transc * b_pad),
        bytes_accessed=int(b_pad * in_f * itemsize + param_bytes
                           + b_pad * out_w * itemsize),
    )

    call = pl.pallas_call(
        kernel,
        grid=grid,
        in_specs=in_specs,
        out_specs=out_spec,
        out_shape=jax.ShapeDtypeStruct((b_pad, out_w), dtype),
        compiler_params=pltpu.CompilerParams(
            dimension_semantics=("parallel",),   # megacore sharding on v7x
            vmem_limit_bytes=vmem_limit),
        cost_estimate=cost,
    )

    def run(x, *ps):
        if b_pad != batch:
            # <8 rows of batch padding at most; feature dim is never padded.
            x = jnp.pad(x, ((0, b_pad - batch), (0, 0)))
        o = call(x, *ps)
        return o[:batch, :out_f]

    return jax.jit(run)


def _fused_forward(modules, x):
    if not modules:
        return x
    batch, in_f = x.shape
    # Cache keyed on module STRUCTURE (not id()) + input shape/dtype; the
    # prepared parameters are passed as runtime args, so structurally identical
    # chains can safely share one compiled kernel.
    sig = tuple(m.signature() for m in modules)
    key = (sig, batch, in_f, str(x.dtype))
    if key not in _FUSED_CACHE:
        _FUSED_CACHE[key] = _build_fused_call(list(modules), batch, in_f, x.dtype)

    params = []
    cur_f, cur_w = in_f, in_f
    for m in modules:
        params.extend(m.prepared_params(cur_w))
        cur_f, cur_w = m.out_widths(cur_f, cur_w)
    return _FUSED_CACHE[key](x, *params)


# ----------------------------------------------------------------------------
# Framework modules (mirror framework.py)
# ----------------------------------------------------------------------------

class PallasModule:
    def forward(self, *inputs):
        raise NotImplementedError

    def getParams(self):
        return []

    # hooks used by the fused sequential kernel
    def signature(self):
        return (type(self).__name__,)

    def prepared_params(self, cur_w):
        return []

    def apply(self, h, param_refs):
        raise NotImplementedError

    def out_widths(self, cur_f, cur_w):
        return cur_f, cur_w

    def per_row_cost(self, cur_w):
        return 0, 0


class Linear(PallasModule):
    def __init__(self, in_features, out_features, key):
        k_w, k_b = jax.random.split(key)
        bound = 1.0 / math.sqrt(in_features)
        self.in_features = in_features
        self.out_features_ = out_features
        self.out_p = _round_up(out_features, LANE)
        self.weight = jax.random.uniform(
            k_w, (in_features, out_features), jnp.float32, -bound, bound)
        self.bias = jax.random.uniform(
            k_b, (1, out_features), jnp.float32, -bound, bound)
        self._prep = {}   # chain input width -> (bf16 padded W, f32 padded b)

    def signature(self):
        return ("Linear", self.in_features, self.out_features_)

    def prepared_params(self, cur_w):
        if cur_w not in self._prep:
            # Zero-pad input dim to the chain's flowing width and output dim to
            # the lane-padded width; cast the weight to bf16 (native MXU path).
            w = jnp.zeros((cur_w, self.out_p), jnp.bfloat16)
            w = w.at[:self.in_features, :self.out_features_].set(
                self.weight.astype(jnp.bfloat16))
            b = jnp.zeros((1, self.out_p), jnp.float32)
            b = b.at[:, :self.out_features_].set(self.bias)
            self._prep[cur_w] = (w, b)
        return list(self._prep[cur_w])

    def apply(self, h, param_refs):
        w_ref, b_ref = param_refs
        # bf16 x bf16 MXU matmul with f32 accumulation; bias add stays f32.
        acc = jnp.dot(h.astype(jnp.bfloat16), w_ref[...],
                      preferred_element_type=jnp.float32)
        return acc + b_ref[...]

    def out_widths(self, cur_f, cur_w):
        return self.out_features_, self.out_p

    def per_row_cost(self, cur_w):
        return 2 * cur_w * self.out_p, 0

    def forward(self, x):
        return _fused_forward([self], x)

    def getParams(self):
        return [self.weight, self.bias]


class ReLU(PallasModule):
    def forward(self, x):
        return _fused_forward([self], x)

    def apply(self, h, param_refs):
        return jnp.maximum(h, 0.0)


class Tanh(PallasModule):
    def forward(self, x):
        return _fused_forward([self], x)

    def apply(self, h, param_refs):
        return jnp.tanh(h)

    def per_row_cost(self, cur_w):
        return 0, cur_w


class Model(PallasModule):
    """Sequential container — same semantics as framework.py:Model.forward,
    but the whole chain executes as ONE fused, jitted Pallas kernel."""

    def __init__(self):
        self.parameters = []
        self.modules = []

    def add(self, layer):
        self.modules.append(layer)

    def forward(self, x):
        return _fused_forward(self.modules, x)

    # TODO(synk): backward() of the reference framework (manual backprop) is
    # training-only and is not implemented as a Pallas kernel here.

    def param(self):
        return [m.getParams() for m in self.modules]


# ----------------------------------------------------------------------------
# Main
# ----------------------------------------------------------------------------

if __name__ == "__main__":
    key = jax.random.PRNGKey(0)
    k_in, k_l1, k_l2, k_l3 = jax.random.split(key, 4)

    batch, in_f, hid, out_f = 8, 32, 64, 8
    x = jax.random.normal(k_in, (batch, in_f), jnp.float32)

    model = Model()
    model.add(Linear(in_f, hid, k_l1))
    model.add(ReLU())
    model.add(Linear(hid, in_f, k_l2))
    model.add(Tanh())
    model.add(Linear(in_f, out_f, k_l3))

    out = model.forward(x)
    out = jax.block_until_ready(out)

    # sanity check against plain-JAX f32 reference of the same module chain
    # (kernel uses bf16 MXU operands with f32 accumulate -> loose tolerance)
    ref = x
    for m in model.modules:
        if isinstance(m, Linear):
            ref = ref @ m.weight + m.bias
        elif isinstance(m, ReLU):
            ref = jnp.maximum(ref, 0.0)
        elif isinstance(m, Tanh):
            ref = jnp.tanh(ref)

    assert out.shape == (batch, out_f)
    assert jnp.allclose(out, ref, atol=2e-2, rtol=2e-2)

    print("KERNEL_OK")
</pallas_src>

<mosaic_0001>
module attributes {stable_mosaic.version = 11 : i64} {
  func.func @kernel(%arg0: i32, %arg1: memref<8x32xf32, #tpu.memory_space<vmem>>, %arg2: memref<32x128xbf16, #tpu.memory_space<vmem>>, %arg3: memref<1x128xf32, #tpu.memory_space<vmem>>, %arg4: memref<128x128xbf16, #tpu.memory_space<vmem>>, %arg5: memref<1x128xf32, #tpu.memory_space<vmem>>, %arg6: memref<128x128xbf16, #tpu.memory_space<vmem>>, %arg7: memref<1x128xf32, #tpu.memory_space<vmem>>, %arg8: memref<8x128xf32, #tpu.memory_space<vmem>>) attributes {dimension_semantics = [#tpu.dimension_semantics<parallel>], iteration_bounds = array<i64: 1>, scalar_prefetch = 0 : i64, scratch_operands = 0 : i64, tpu.core_type = #tpu.core_type<tc>, window_params = [{transform_indices = @transform_0, window_bounds = array<i64: 8, 32>}, {pipeline_mode = #tpu.pipeline_mode<synchronous>, transform_indices = @transform_1, window_bounds = array<i64: 32, 128>}, {pipeline_mode = #tpu.pipeline_mode<synchronous>, transform_indices = @transform_2, window_bounds = array<i64: 1, 128>}, {pipeline_mode = #tpu.pipeline_mode<synchronous>, transform_indices = @transform_3, window_bounds = array<i64: 128, 128>}, {pipeline_mode = #tpu.pipeline_mode<synchronous>, transform_indices = @transform_4, window_bounds = array<i64: 1, 128>}, {pipeline_mode = #tpu.pipeline_mode<synchronous>, transform_indices = @transform_5, window_bounds = array<i64: 128, 128>}, {pipeline_mode = #tpu.pipeline_mode<synchronous>, transform_indices = @transform_6, window_bounds = array<i64: 1, 128>}, {transform_indices = @transform_7, window_bounds = array<i64: 8, 128>}]} {
    %c0 = arith.constant 0 : index
    %c0_0 = arith.constant 0 : index
    %0 = vector.load %arg1[%c0, %c0_0] : memref<8x32xf32, #tpu.memory_space<vmem>>, vector<8x32xf32>
    %1 = arith.truncf %0 : vector<8x32xf32> to vector<8x32xbf16>
    %c0_1 = arith.constant 0 : index
    %c0_2 = arith.constant 0 : index
    %2 = vector.load %arg2[%c0_1, %c0_2] : memref<32x128xbf16, #tpu.memory_space<vmem>>, vector<32x128xbf16>
    %cst = arith.constant dense<0.000000e+00> : vector<8x128xf32>
    %3 = tpu.matmul %1, %2, %cst {dimension_numbers = #tpu.dot_dimension_numbers<[1], [0], [0], [1], [0, 0, 1, 1], [], []>} : vector<8x32xbf16>, vector<32x128xbf16>, vector<8x128xf32> -> vector<8x128xf32>
    %c0_3 = arith.constant 0 : index
    %c0_4 = arith.constant 0 : index
    %4 = vector.load %arg3[%c0_3, %c0_4] : memref<1x128xf32, #tpu.memory_space<vmem>>, vector<1x128xf32>
    %5 = vector.broadcast %4 : vector<1x128xf32> to vector<8x128xf32>
    %6 = arith.addf %3, %5 : vector<8x128xf32>
    %cst_5 = arith.constant 0.000000e+00 : f32
    %7 = vector.broadcast %cst_5 : f32 to vector<8x128xf32>
    %8 = arith.maximumf %6, %7 : vector<8x128xf32>
    %9 = arith.truncf %8 : vector<8x128xf32> to vector<8x128xbf16>
    %c0_6 = arith.constant 0 : index
    %c0_7 = arith.constant 0 : index
    %10 = vector.load %arg4[%c0_6, %c0_7] : memref<128x128xbf16, #tpu.memory_space<vmem>>, vector<128x128xbf16>
    %cst_8 = arith.constant dense<0.000000e+00> : vector<8x128xf32>
    %11 = tpu.matmul %9, %10, %cst_8 {dimension_numbers = #tpu.dot_dimension_numbers<[1], [0], [0], [1], [0, 0, 1, 1], [], []>} : vector<8x128xbf16>, vector<128x128xbf16>, vector<8x128xf32> -> vector<8x128xf32>
    %c0_9 = arith.constant 0 : index
    %c0_10 = arith.constant 0 : index
    %12 = vector.load %arg5[%c0_9, %c0_10] : memref<1x128xf32, #tpu.memory_space<vmem>>, vector<1x128xf32>
    %13 = vector.broadcast %12 : vector<1x128xf32> to vector<8x128xf32>
    %14 = arith.addf %11, %13 : vector<8x128xf32>
    %15 = math.tanh %14 : vector<8x128xf32>
    %16 = arith.truncf %15 : vector<8x128xf32> to vector<8x128xbf16>
    %c0_11 = arith.constant 0 : index
    %c0_12 = arith.constant 0 : index
    %17 = vector.load %arg6[%c0_11, %c0_12] : memref<128x128xbf16, #tpu.memory_space<vmem>>, vector<128x128xbf16>
    %cst_13 = arith.constant dense<0.000000e+00> : vector<8x128xf32>
    %18 = tpu.matmul %16, %17, %cst_13 {dimension_numbers = #tpu.dot_dimension_numbers<[1], [0], [0], [1], [0, 0, 1, 1], [], []>} : vector<8x128xbf16>, vector<128x128xbf16>, vector<8x128xf32> -> vector<8x128xf32>
    %c0_14 = arith.constant 0 : index
    %c0_15 = arith.constant 0 : index
    %19 = vector.load %arg7[%c0_14, %c0_15] : memref<1x128xf32, #tpu.memory_space<vmem>>, vector<1x128xf32>
    %20 = vector.broadcast %19 : vector<1x128xf32> to vector<8x128xf32>
    %21 = arith.addf %18, %20 : vector<8x128xf32>
    %c0_16 = arith.constant 0 : index
    %c0_17 = arith.constant 0 : index
    %22 = vector.load %arg8[%c0_16, %c0_17] : memref<8x128xf32, #tpu.memory_space<vmem>>, vector<8x128xf32>
    tpu.vector_store %arg8[%c0_16, %c0_17], %21 {strides = array<i32>} : memref<8x128xf32, #tpu.memory_space<vmem>>, vector<8x128xf32>,
    return
  }
  func.func @transform_0(%arg0: i32) -> (i32, i32) {
    %c0_i32 = arith.constant 0 : i32
    %c0_i32_0 = arith.constant 0 : i32
    return %arg0, %c0_i32 : i32, i32
  }
  func.func @transform_1(%arg0: i32) -> (i32, i32) {
    %c0_i32 = arith.constant 0 : i32
    %c0_i32_0 = arith.constant 0 : i32
    %c0_i32_1 = arith.constant 0 : i32
    return %c0_i32, %c0_i32_0 : i32, i32
  }
  func.func @transform_2(%arg0: i32) -> (i32, i32) {
    %c0_i32 = arith.constant 0 : i32
    %c0_i32_0 = arith.constant 0 : i32
    %c0_i32_1 = arith.constant 0 : i32
    return %c0_i32, %c0_i32_0 : i32, i32
  }
  func.func @transform_3(%arg0: i32) -> (i32, i32) {
    %c0_i32 = arith.constant 0 : i32
    %c0_i32_0 = arith.constant 0 : i32
    %c0_i32_1 = arith.constant 0 : i32
    return %c0_i32, %c0_i32_0 : i32, i32
  }
  func.func @transform_4(%arg0: i32) -> (i32, i32) {
    %c0_i32 = arith.constant 0 : i32
    %c0_i32_0 = arith.constant 0 : i32
    %c0_i32_1 = arith.constant 0 : i32
    return %c0_i32, %c0_i32_0 : i32, i32
  }
  func.func @transform_5(%arg0: i32) -> (i32, i32) {
    %c0_i32 = arith.constant 0 : i32
    %c0_i32_0 = arith.constant 0 : i32
    %c0_i32_1 = arith.constant 0 : i32
    return %c0_i32, %c0_i32_0 : i32, i32
  }
  func.func @transform_6(%arg0: i32) -> (i32, i32) {
    %c0_i32 = arith.constant 0 : i32
    %c0_i32_0 = arith.constant 0 : i32
    %c0_i32_1 = arith.constant 0 : i32
    return %c0_i32, %c0_i32_0 : i32, i32
  }
  func.func @transform_7(%arg0: i32) -> (i32, i32) {
    %c0_i32 = arith.constant 0 : i32
    %c0_i32_0 = arith.constant 0 : i32
    return %arg0, %c0_i32 : i32, i32
  }
}

</mosaic_0001>

<bundles_post_ra>
// kernel: run.1
= control target key start
LH: loop header
LB: loop body
LE: loop exit
PB: predicated region body
PF: predicated region fallthrough
CT: control target
= control target key end

     0   :  { %12 = vsyncpa [#allocation3], 0  ;;  %s783_s0 = inlined_call_operand.hbm [shape: f32[8,32], index: 0, kind: input, shape index: {}]   ;;  %s784_s1 = inlined_call_operand.hbm [shape: bf16[32,128], index: 1, kind: input, shape index: {}]   ;;  %s785_s2 = inlined_call_operand.vmem [shape: f32[1,128], index: 2, kind: input, shape index: {}]   ;;  %s786_s3 = inlined_call_operand.hbm [shape: bf16[128,128], index: 3, kind: input, shape index: {}]   ;;  %s787_s4 = inlined_call_operand.vmem [shape: f32[1,128], index: 4, kind: input, shape index: {}]   ;;  %s788_s5 = inlined_call_operand.hbm [shape: bf16[128,128], index: 5, kind: input, shape index: {}]   ;;  %s789_s6 = inlined_call_operand.vmem [shape: f32[1,128], index: 6, kind: input, shape index: {}]   ;;  %s790_s7 = inlined_call_operand.hbm [shape: f32[8,128], index: 7, kind: output, shape index: {}]  }
   0x1   :  { %13 = vsyncpa [#allocation6], 0 }
   0x2   :  { %14 = vsyncpa [#allocation9], 0 }
   0x3   :  { %15 = vsyncpa [#allocation4], 0  ;;  %s632_s24 = smov [#allocation5]   ;;  %s514_s28 = scalar_lea.hbm %s784_s1, 256 }
   0x4   :  { %s31_s25 = sshll.u32 %s632_s24, 4  ;;  %p515_p0 = scmp.ne.s32.totalorder %s784_s1, %s514_s28  ;;  %s32_s25 = int_to_ptr.vmem [resolvable:$true] %s31_s25 }
   0x5   :  { %p518_p1 = scmp.lt.u32.totalorder %s514_s28, %s784_s1 }
   0x7   :  { %p520_p2 = pnand %p518_p1, %p515_p0 }
   0x9   :  { %523 = shalt.err (!%p520_p2)
}
   0xa   :  { %s524_s10 = scalar_lea.vmem %s32_s25, 256  ;;  %p529_p4 = scmp.lt.s32.totalorder %s32_s25, %s32_s25 }
   0xb   :  { %p525_p3 = scmp.ne.s32.totalorder %s32_s25, %s524_s10  ;;  %p530_p5 = scmp.lt.s32.totalorder %s524_s10, %s524_s10 }
   0xd   :  { %p531_p6 = por %p530_p5, %p529_p4 }
   0xf   :  { %p532_p7 = pnand %p531_p6, %p525_p3 }
  0x11   :  { %535 = shalt.err (!%p532_p7)
}
  0x12   :  { %s633_s11 = smov 64   ;;  %s634_s12 = smov 4  }
  0x13   :  { %37 = dma.hbm_to_vmem [thread:$0]  %s784_s1, 256, %s32_s25, [#allocation6], %s633_s11, %s633_s11, %s634_s12  }
  0x14   :  { %s635_s15 = smov [#allocation2]   ;;  %s636_s17 = smov [#allocation7]  }
  0x15   :  { %s22_s16 = sshll.u32 %s635_s15, 4  ;;  %s45_s18 = sshll.u32 %s636_s17, 4  ;;  %s23_s16 = int_to_ptr.vmem [resolvable:$true] %s22_s16  ;;  %s46_s18 = int_to_ptr.vmem [resolvable:$true] %s45_s18 }
  0x16   :  { %s536_s21 = scalar_lea.hbm %s783_s0, 128 }
  0x17   :  { %p537_p8 = scmp.ne.s32.totalorder %s783_s0, %s536_s21  ;;  %p540_p9 = scmp.lt.u32.totalorder %s536_s21, %s783_s0 }
  0x19   :  { %p542_p10 = pnand %p540_p9, %p537_p8 }
  0x1b   :  { %545 = shalt.err (!%p542_p10)
}
  0x1c   :  { %s546_s1 = scalar_lea.vmem %s23_s16, 128  ;;  %p551_p12 = scmp.lt.s32.totalorder %s23_s16, %s23_s16 }
  0x1d   :  { %p547_p11 = scmp.ne.s32.totalorder %s23_s16, %s546_s1  ;;  %p552_p13 = scmp.lt.s32.totalorder %s546_s1, %s546_s1 }
  0x1f   :  { %p553_p0 = por %p552_p13, %p551_p12 }
  0x21   :  { %p554_p1 = pnand %p553_p0, %p547_p11 }
  0x23   :  { %557 = shalt.err (!%p554_p1)
}
  0x24   :  { %25 = dma.hbm_to_vmem [thread:$0]  %s783_s0, 128, %s23_s16, [#allocation3]  }
  0x25   :  { %s558_s30 = scalar_lea.hbm %s786_s3, 1024 }
  0x26   :  { %p559_p2 = scmp.ne.s32.totalorder %s786_s3, %s558_s30  ;;  %p562_p3 = scmp.lt.u32.totalorder %s558_s30, %s786_s3 }
  0x28   :  { %p564_p4 = pnand %p562_p3, %p559_p2 }
  0x2a   :  { %567 = shalt.err (!%p564_p4)
}
  0x2b   :  { %s568_s14 = scalar_lea.vmem %s46_s18, 1024  ;;  %p573_p6 = scmp.lt.s32.totalorder %s46_s18, %s46_s18 }
  0x2c   :  { %p569_p5 = scmp.ne.s32.totalorder %s46_s18, %s568_s14  ;;  %p574_p7 = scmp.lt.s32.totalorder %s568_s14, %s568_s14 }
  0x2e   :  { %p575_p8 = por %p574_p7, %p573_p6 }
  0x30   :  { %p576_p9 = pnand %p575_p8, %p569_p5 }
  0x32   :  { %579 = shalt.err (!%p576_p9)
}
  0x33   :  { %51 = dma.hbm_to_vmem [thread:$0]  %s786_s3, 1024, %s46_s18, [#allocation6], %s633_s11, %s633_s11, %s634_s12  }
  0x34   :  { %s637_s16 = smov [#allocation8]   ;;  %s580_s21 = scalar_lea.hbm %s788_s5, 1024 }
  0x35   :  { %s59_s17 = sshll.u32 %s637_s16, 4  ;;  %p581_p10 = scmp.ne.s32.totalorder %s788_s5, %s580_s21  ;;  %s60_s17 = int_to_ptr.vmem [resolvable:$true] %s59_s17 }
  0x36   :  { %p584_p11 = scmp.lt.u32.totalorder %s580_s21, %s788_s5 }
  0x38   :  { %p586_p12 = pnand %p584_p11, %p581_p10 }
  0x3a   :  { %589 = shalt.err (!%p586_p12)
}
  0x3b   :  { %s590_s1 = scalar_lea.vmem %s60_s17, 1024  ;;  %p595_p0 = scmp.lt.s32.totalorder %s60_s17, %s60_s17 }
  0x3c   :  { %p591_p13 = scmp.ne.s32.totalorder %s60_s17, %s590_s1  ;;  %p596_p1 = scmp.lt.s32.totalorder %s590_s1, %s590_s1 }
  0x3e   :  { %p597_p2 = por %p596_p1, %p595_p0 }
  0x40   :  { %p598_p3 = pnand %p597_p2, %p591_p13 }
  0x42   :  { %601 = shalt.err (!%p598_p3)
}
  0x43   :  { %65 = dma.hbm_to_vmem [thread:$0]  %s788_s5, 1024, %s60_s17, [#allocation9], %s633_s11, %s633_s11, %s634_s12  }
  0x44   :  { %624 = dma.done.wait [#allocation3], 128  }
  0x45   :  { %625 = vsyncadd [#allocation3], 4294967168 }
  0x46   :  { %626 = dma.done.wait [#allocation6], 1280  }
  0x47   :  { %627 = vsyncadd [#allocation6], 4294966016 }
  0x48   :  { %628 = dma.done.wait [#allocation9], 1024  }
  0x49   :  { %629 = vsyncadd [#allocation9], 4294966272  ;;  %v638_v0 = vmov 0.0   ;;  %vm639_vm0 = vmmov 0   ;;  %v494_v1 = vld [vmem:[#allocation5] sm:$0xff]   ;;  %v495_v2 = vld [vmem:[#allocation5 + $0x8] sm:$0xff]  }
  0x4a   :  { %437 = vmatprep.subr.bf16.mxu0 %v638_v0  ;;  %441 = vmatprep.mubr.msk.bf16.mxu0 %vm639_vm0, %v638_v0  ;;  %v81_v3 = vld [vmem:[#allocation2] sm:$0xff]  ;;  %v496_v4 = vld [vmem:[#allocation7] sm:$0xff]   ;;  %vm106_vm1 = vcmask 261120   ;;  %v498_v7 = vld [vmem:[#allocation7 + $0x10] sm:$0xff]   ;;  %s640_s28 = smov [#allocation10]  }
  0x4b   :  { %445 = vmatprep.subr.bf16.mxu1 %v638_v0  ;;  %461 = vmatprep.mubr.msk.bf16.mxu1 %vm639_vm0, %v638_v0  ;;  %v82_v5 = vpack.c.bf16 %v81_v3, %v81_v3  ;;  %v497_v6 = vld [vmem:[#allocation7 + $0x8] sm:$0xff]   ;;  %v499_v8 = vld [vmem:[#allocation7 + $0x18] sm:$0xff]   ;;  %v500_v9 = vld [vmem:[#allocation7 + $0x20] sm:$0xff]   ;;  %s383_s29 = sshll.u32 %s640_s28, 4  ;;  %s384_s29 = int_to_ptr.vmem [resolvable:$true] %s383_s29 }
  0x4c   :  { %438 = vmatpush3.bf16.msra.mxu0 %v494_v1  ;;  %446 = vmatpush3.bf16.msra.mxu1 %v496_v4  ;;  %v501_v10 = vld [vmem:[#allocation7 + $0x28] sm:$0xff]   ;;  %v502_v11 = vld [vmem:[#allocation7 + $0x30] sm:$0xff]   ;;  %v503_v12 = vld [vmem:[#allocation7 + $0x38] sm:$0xff]   ;;  %p607_p5 = scmp.lt.s32.totalorder %s384_s29, %s384_s29 }
  0x4d   :  { %439 = vmatprep.subr.bf16.mxu0 %v638_v0  ;;  %447 = vmatprep.subr.bf16.mxu1 %v638_v0  ;;  %v504_v13 = vld [vmem:[#allocation8] sm:$0xff]   ;;  %v505_v14 = vld [vmem:[#allocation8 + $0x8] sm:$0xff]   ;;  %v506_v15 = vld [vmem:[#allocation8 + $0x10] sm:$0xff]  }
  0x4e   :  { %v507_v16 = vld [vmem:[#allocation8 + $0x18] sm:$0xff]   ;;  %v394_v17 = vld [vmem:[%s785_s2] ss:$0 sm:$0xff]  ;;  %v508_v25 = vld [vmem:[#allocation8 + $0x20] sm:$0xff]  }
  0x4f   :  { %v509_v26 = vld [vmem:[#allocation8 + $0x28] sm:$0xff]   ;;  %v510_v27 = vld [vmem:[#allocation8 + $0x30] sm:$0xff]   ;;  %v511_v28 = vld [vmem:[#allocation8 + $0x38] sm:$0xff]  }
  0x50   :  { %440 = vmatpush3.bf16.msra.mxu0 %v495_v2  ;;  %448 = vmatpush3.bf16.msra.mxu1 %v497_v6  ;;  %v398_v29 = vld [vmem:[%s787_s4] ss:$0 sm:$0xff]  ;;  %s602_s4 = scalar_lea.vmem %s384_s29, 128 }
  0x51   :  { %465 = vmatprep.subr.bf16.mxu0 %v638_v0  ;;  %449 = vmatprep.subr.bf16.mxu1 %v638_v0  ;;  %v407_v37 = vld [vmem:[%s789_s6] ss:$0 sm:$0xff]  ;;  %p603_p4 = scmp.ne.s32.totalorder %s384_s29, %s602_s4  ;;  %p608_p6 = scmp.lt.s32.totalorder %s602_s4, %s602_s4 }
  0x53   :  { %442 = vmatmul.mubr.msk.bf16.vlgmr.msra.gmra.mrb[0].mxu0 %vm106_vm1, %v82_v5  ;;  %p609_p7 = por %p608_p6, %p607_p5 }
  0x54   :  { %481 = vmatprep.mubr.msk.bf16.mxu0 %vm639_vm0, %v638_v0  ;;  %450 = vmatpush3.bf16.msra.mxu1 %v498_v7 }
  0x55   :  { %451 = vmatprep.subr.bf16.mxu1 %v638_v0  ;;  %466 = vmatpush3.bf16.msra.mxu0 %v504_v13  ;;  %p610_p8 = pnand %p609_p7, %p603_p4 }
  0x56   :  { %467 = vmatprep.subr.bf16.mxu0 %v638_v0 }
  0x58   :  { %452 = vmatpush3.bf16.msra.mxu1 %v499_v8 }
  0x59   :  { %453 = vmatprep.subr.bf16.mxu1 %v638_v0  ;;  %468 = vmatpush3.bf16.msra.mxu0 %v505_v14 }
  0x5a   :  { %469 = vmatprep.subr.bf16.mxu0 %v638_v0 }
  0x5c   :  { %454 = vmatpush3.bf16.msra.mxu1 %v500_v9 }
  0x5d   :  { %455 = vmatprep.subr.bf16.mxu1 %v638_v0  ;;  %470 = vmatpush3.bf16.msra.mxu0 %v506_v15 }
  0x5e   :  { %471 = vmatprep.subr.bf16.mxu0 %v638_v0 }
  0x60   :  { %456 = vmatpush3.bf16.msra.mxu1 %v501_v10 }
  0x61   :  { %457 = vmatprep.subr.bf16.mxu1 %v638_v0  ;;  %472 = vmatpush3.bf16.msra.mxu0 %v507_v16 }
  0x62   :  { %473 = vmatprep.subr.bf16.mxu0 %v638_v0 }
  0x64   :  { %458 = vmatpush3.bf16.msra.mxu1 %v502_v11 }
  0x65   :  { %459 = vmatprep.subr.bf16.mxu1 %v638_v0  ;;  %474 = vmatpush3.bf16.msra.mxu0 %v508_v25 }
  0x66   :  { %475 = vmatprep.subr.bf16.mxu0 %v638_v0 }
  0x68   :  { %460 = vmatpush3.bf16.msra.mxu1 %v503_v12 }
  0x69   :  { %476 = vmatpush3.bf16.msra.mxu0 %v509_v26 }
  0x6a   :  { %477 = vmatprep.subr.bf16.mxu0 %v638_v0 }
  0x6d   :  { %478 = vmatpush3.bf16.msra.mxu0 %v510_v27 }
  0x6e   :  { %479 = vmatprep.subr.bf16.mxu0 %v638_v0 }
  0x71   :  { %480 = vmatpush3.bf16.msra.mxu0 %v511_v28 }
 0x126   :  { %v144_v18 = vpop.f32.mrb[0].mxu0 }
 0x127   :  { %v145_v19 = vadd.f32 %v394_v17, %v144_v18  ;;  %v443_v20 = vpop.f32.mrb[1].mxu0 }
 0x128   :  { %v147_v21 = vpop.f32.mrb[2].mxu0 }
 0x129   :  { %v150_v22 = vmax.f32 %v145_v19, 0.0  ;;  %v444_v23 = vpop.f32.mrb[3].mxu0 }
 0x12b   :  { %v151_v24 = vpack.c.bf16 %v150_v22, %v150_v22 }
 0x12d   :  { %462 = vmatmul.mubr.bf16.vlgmr.msra.gmra.mrb[0].mxu1 %v151_v24 }
 0x200   :  { %v257_v30 = vpop.f32.mrb[0].mxu1 }
 0x201   :  { %v258_v31 = vadd.f32 %v398_v29, %v257_v30  ;;  %v463_v32 = vpop.f32.mrb[1].mxu1 }
 0x202   :  { %v260_v33 = vpop.f32.mrb[2].mxu1 }
 0x203   :  { %512 = vtanh.f32 %v258_v31  ;;  %v464_v34 = vpop.f32.mrb[3].mxu1 }
 0x20d   :  { %v513_v35 = vpop.eup %512 }
 0x20e   :  { %v264_v36 = vpack.c.bf16 %v513_v35, %v513_v35 }
 0x210   :  { %482 = vmatmul.mubr.bf16.vlgmr.msra.gmra.mrb[4].mxu0 %v264_v36 }
 0x2e3   :  { %v370_v38 = vpop.f32.mrb[4].mxu0 }
 0x2e4   :  { %v371_v39 = vadd.f32 %v407_v37, %v370_v38  ;;  %v483_v40 = vpop.f32.mrb[5].mxu0 }
 0x2e5   :  { %v373_v41 = vpop.f32.mrb[6].mxu0 }
 0x2e6   :  { %376 = vst [vmem:[#allocation10] sm:$0xff] %v371_v39  ;;  %v484_v42 = vpop.f32.mrb[7].mxu0 }
 0x2e7   :  { %613 = shalt.err (!%p610_p8)
}
 0x2e8   :  { %s614_s6 = scalar_lea.hbm %s790_s7, 128 }
 0x2e9   :  { %p615_p9 = scmp.ne.s32.totalorder %s790_s7, %s614_s6  ;;  %p618_p10 = scmp.lt.u32.totalorder %s614_s6, %s790_s7 }
 0x2eb   :  { %p620_p11 = pnand %p618_p10, %p615_p9 }
 0x2ed   :  { %623 = shalt.err (!%p620_p11)
}
 0x2ee   :  { %386 = dma.vmem_to_hbm [thread:$0]  %s384_s29, 128, %s790_s7, [#allocation4]  }
 0x2ef   :  { %630 = dma.done.wait [#allocation4], 128  }
 0x2f0   :  { %631 = vsyncadd [#allocation4], 4294967168 }
 0x2f1   :  { %390 = vsyncpa [#allocation3], 1 }
 0x2f2   :  { %391 = vsyncpa [#allocation6], 1 }
 0x2f3   :  { %392 = vsyncpa [#allocation9], 1 }
 0x2f4   :  { %393 = vsyncpa [#allocation4], 1 }

</bundles_post_ra>
